<compile_context>
chip_gen: v7x
topology: tpu7x:2x2x1
jax: 0.10.0
libtpu: 0.0.40
codegen_flags: <defaults>
</compile_context>

<pallas_src>
import jax
import jax.numpy as jnp
from jax import lax
from jax.experimental import pallas as pl
from jax.experimental.pallas import tpu as pltpu


def _round_up(x: int, m: int) -> int:
    return (x + m - 1) // m * m


def _cdiv(a: int, b: int) -> int:
    return (a + b - 1) // b


# ---------------------------------------------------------------------------
# Fast path: tables live in VMEM, gather via one-hot MXU matmul.
# ---------------------------------------------------------------------------
def _mf_onehot_kernel(uidx_ref, iidx_ref, bias_ref, u_tbl_ref, i_tbl_ref, out_ref):
    nu, d = u_tbl_ref.shape
    ni = i_tbl_ref.shape[0]
    tb = out_ref.shape[-1]

    u_col = uidx_ref[...]                                              # (tb, 1) int32
    i_col = iidx_ref[...]
    oh_u = (lax.broadcasted_iota(jnp.int32, (tb, nu), 1) == u_col).astype(jnp.float32)
    oh_i = (lax.broadcasted_iota(jnp.int32, (tb, ni), 1) == i_col).astype(jnp.float32)

    ue = jnp.dot(oh_u, u_tbl_ref[...], preferred_element_type=jnp.float32,
                 precision=lax.Precision.HIGHEST)                      # (tb, D)
    ie = jnp.dot(oh_i, i_tbl_ref[...], preferred_element_type=jnp.float32,
                 precision=lax.Precision.HIGHEST)                      # (tb, D)
    prod = ue * ie

    # Lane-dense reduce over D: (1, D) x (tb, D)^T -> (1, tb) on the MXU.
    ones_row = jnp.ones((1, d), jnp.float32)
    dot = lax.dot_general(ones_row, prod, (((1,), (1,)), ((), ())),
                          preferred_element_type=jnp.float32,
                          precision=lax.Precision.HIGHEST)             # (1, tb)
    out_ref[...] = dot + bias_ref[...]


def _forward_onehot(uidx_col, iidx_col, bias, u_tbl, i_tbl, *, tb, grid):
    nu, d = u_tbl.shape
    ni = i_tbl.shape[0]
    b_pad = grid * tb
    return pl.pallas_call(
        _mf_onehot_kernel,
        out_shape=jax.ShapeDtypeStruct((grid, 1, tb), jnp.float32),
        grid_spec=pltpu.PrefetchScalarGridSpec(
            num_scalar_prefetch=0,
            grid=(grid,),
            in_specs=[
                pl.BlockSpec((tb, 1), lambda t: (t, 0)),               # user idx column
                pl.BlockSpec((tb, 1), lambda t: (t, 0)),               # item idx column
                pl.BlockSpec((None, 1, tb), lambda t: (t, 0, 0)),      # folded bias
                pl.BlockSpec((nu, d), lambda t: (0, 0)),               # user table (VMEM resident)
                pl.BlockSpec((ni, d), lambda t: (0, 0)),               # item table (VMEM resident)
            ],
            out_specs=pl.BlockSpec((None, 1, tb), lambda t: (t, 0, 0)),
        ),
        compiler_params=pltpu.CompilerParams(
            dimension_semantics=("parallel",),
            vmem_limit_bytes=32 * 1024 * 1024),
        cost_estimate=pl.CostEstimate(
            flops=2 * b_pad * d * (nu + ni + 1),
            transcendentals=0,
            bytes_accessed=4 * ((nu + ni) * d + 4 * b_pad)),
    )(uidx_col, iidx_col, bias, u_tbl, i_tbl)


# ---------------------------------------------------------------------------
# Gather path: tables stay in HBM, chunked + double-buffered row-DMA gather.
# ---------------------------------------------------------------------------
def _mf_gather_kernel(uidx_ref, iidx_ref,        # (b_pad,) int32 scalar prefetch (SMEM)
                      bias_ref,                  # (1, tb) f32 VMEM (lane-dense)
                      u_tbl, i_tbl,              # full tables, HBM (pl.ANY)
                      out_ref,                   # (1, tb) f32 VMEM (lane-dense)
                      ue_buf, ie_buf,            # (2, chunk, D) f32 VMEM double buffers
                      sems):                     # (2, 2) DMA semaphores (table x slot)
    _, chunk, d = ue_buf.shape
    tb = out_ref.shape[-1]
    n_chunks = tb // chunk
    base = pl.multiple_of(pl.program_id(0) * tb, tb)

    def issue(c, slot):
        off = base + c * chunk
        def body(r, carry):
            u = uidx_ref[off + r]
            i = iidx_ref[off + r]
            pltpu.make_async_copy(u_tbl.at[u], ue_buf.at[slot, r], sems.at[0, slot]).start()
            pltpu.make_async_copy(i_tbl.at[i], ie_buf.at[slot, r], sems.at[1, slot]).start()
            return carry
        # Unrolled issue loop: lets the scheduler co-issue index loads,
        # address math and descriptor pushes.
        lax.fori_loop(0, chunk, body, 0, unroll=8)

    def drain(slot):
        # ONE byte-counting wait per (table, slot): the descriptor covers a
        # (chunk, D) slab — exactly the total bytes of the `chunk` row copies
        # issued against the same semaphore, so a single wait drains them all.
        # (src is just a same-shaped dummy; wait only needs dst + semaphore.)
        pltpu.make_async_copy(ue_buf.at[1 - slot], ue_buf.at[slot], sems.at[0, slot]).wait()
        pltpu.make_async_copy(ie_buf.at[1 - slot], ie_buf.at[slot], sems.at[1, slot]).wait()

    ones_row = jnp.ones((1, d), jnp.float32)

    issue(0, 0)
    dots = []
    for c in range(n_chunks):                    # static chunk loop (static offsets)
        slot = c & 1
        if c + 1 < n_chunks:
            issue(c + 1, 1 - slot)               # prefetch next chunk (double buffer)
        drain(slot)
        prod = ue_buf[slot] * ie_buf[slot]       # (chunk, D) on the VPU
        dots.append(lax.dot_general(ones_row, prod, (((1,), (1,)), ((), ())),
                                    preferred_element_type=jnp.float32,
                                    precision=lax.Precision.HIGHEST))  # (1, chunk)
    dot = dots[0] if n_chunks == 1 else jnp.concatenate(dots, axis=1)  # (1, tb)
    out_ref[...] = dot + bias_ref[...]


def _forward_gather(uidx, iidx, bias, u_tbl, i_tbl, *, tb, grid, chunk):
    d = u_tbl.shape[1]
    b_pad = grid * tb
    return pl.pallas_call(
        _mf_gather_kernel,
        out_shape=jax.ShapeDtypeStruct((grid, 1, tb), jnp.float32),
        grid_spec=pltpu.PrefetchScalarGridSpec(
            num_scalar_prefetch=2,
            grid=(grid,),
            in_specs=[
                pl.BlockSpec((None, 1, tb), lambda t, *_: (t, 0, 0)),  # folded bias
                pl.BlockSpec(memory_space=pl.ANY),                     # user table (HBM)
                pl.BlockSpec(memory_space=pl.ANY),                     # item table (HBM)
            ],
            out_specs=pl.BlockSpec((None, 1, tb), lambda t, *_: (t, 0, 0)),
            scratch_shapes=[
                pltpu.VMEM((2, chunk, d), jnp.float32),
                pltpu.VMEM((2, chunk, d), jnp.float32),
                pltpu.SemaphoreType.DMA((2, 2)),
            ],
        ),
        compiler_params=pltpu.CompilerParams(
            dimension_semantics=("parallel",),
            vmem_limit_bytes=32 * 1024 * 1024),
        cost_estimate=pl.CostEstimate(
            flops=4 * b_pad * d,
            transcendentals=0,
            # gather reads (inflated for random-access row DMAs) + idx/bias/out
            bytes_accessed=4 * (3 * b_pad * d + 4 * b_pad)),
    )(uidx, iidx, bias, u_tbl, i_tbl)


# ---------------------------------------------------------------------------
# Wrapper
# ---------------------------------------------------------------------------
def matrix_factorization_forward(user_indices, item_indices, params, *,
                                 tb_max=512, force_gather=False):
    u_tbl = params["user_embedding"].astype(jnp.float32)
    i_tbl = params["item_embedding"].astype(jnp.float32)
    nu, d = u_tbl.shape
    ni = i_tbl.shape[0]
    B = int(user_indices.shape[0])

    # Fold user_bias + item_bias + global_bias into one per-example term
    # (tiny gathers) -> a single lane-dense bias stream into the kernel.
    bias = (jnp.take(params["user_bias"][:, 0], user_indices, axis=0)
            + jnp.take(params["item_bias"][:, 0], item_indices, axis=0)
            + params["global_bias"][0]).astype(jnp.float32)             # (B,)

    # Batch tile: large, but clamped so medium batches get >= 2 grid steps
    # (so ("parallel",) dimension semantics can use both v7x TensorCores).
    tb = min(tb_max, max(8, _round_up(_cdiv(B, 2), 8)))

    # VMEM-resident fast path if the tables (double-buffer budgeted) fit well
    # inside the scoped VMEM limit we request (32 MiB, safe on v5e/v6e/v7x).
    table_bytes = (nu + ni) * d * 4
    use_onehot = (not force_gather) and (2 * table_bytes <= 12 * 1024 * 1024)

    chunk = 64
    if not use_onehot:
        if tb >= chunk:
            tb = _round_up(tb, chunk)   # chunked, double-buffered gather
        else:
            chunk = tb                  # tiny batch: single chunk

    b_pad = _round_up(B, tb)
    grid = b_pad // tb
    pad = b_pad - B

    uidx = jnp.pad(user_indices.astype(jnp.int32), (0, pad))            # (b_pad,)
    iidx = jnp.pad(item_indices.astype(jnp.int32), (0, pad))
    bias_t = jnp.pad(bias, (0, pad)).reshape(grid, 1, tb)                # lane-dense

    if use_onehot:
        out = _forward_onehot(uidx.reshape(b_pad, 1), iidx.reshape(b_pad, 1),
                              bias_t, u_tbl, i_tbl, tb=tb, grid=grid)
    else:
        out = _forward_gather(uidx, iidx, bias_t, u_tbl, i_tbl,
                              tb=tb, grid=grid, chunk=chunk)
    return out.reshape(-1)[:B]                    # (B,) matches torch forward


def init_params(key, num_users, num_items, embedding_dim):
    k1, k2, k3, k4 = jax.random.split(key, 4)
    return {
        # matches .uniform_(-0.1, 0.1) in the module's __init__
        "user_embedding": jax.random.uniform(
            k1, (num_users, embedding_dim), jnp.float32, -0.1, 0.1),
        "item_embedding": jax.random.uniform(
            k2, (num_items, embedding_dim), jnp.float32, -0.1, 0.1),
        # nn.Embedding default init is N(0, 1)
        "user_bias": jax.random.normal(k3, (num_users, 1), jnp.float32),
        "item_bias": jax.random.normal(k4, (num_items, 1), jnp.float32),
        "global_bias": jnp.zeros((1,), jnp.float32),
    }


def reference_forward(user_indices, item_indices, params):
    ue = params["user_embedding"][user_indices]
    ie = params["item_embedding"][item_indices]
    dot = jnp.sum(ue * ie, axis=1)
    bias = (params["user_bias"][user_indices][:, 0]
            + params["item_bias"][item_indices][:, 0]
            + params["global_bias"][0])
    return dot + bias


if __name__ == "__main__":
    num_users, num_items, embedding_dim = 64, 32, 128

    key = jax.random.PRNGKey(0)
    kp, ku, ki, ku2, ki2 = jax.random.split(key, 5)
    params = init_params(kp, num_users, num_items, embedding_dim)

    # Case 1: small batch, fast (VMEM-resident one-hot) path.
    batch = 16
    u_idx = jax.random.randint(ku, (batch,), 0, num_users, jnp.int32)
    i_idx = jax.random.randint(ki, (batch,), 0, num_items, jnp.int32)
    ref = reference_forward(u_idx, i_idx, params)
    out = jax.block_until_ready(matrix_factorization_forward(u_idx, i_idx, params))
    assert out.shape == (batch,)
    assert jnp.allclose(out, ref, atol=1e-5, rtol=1e-5), (out, ref)

    # Case 2: same inputs, forced HBM row-DMA gather path (single chunk, grid of 2).
    out2 = jax.block_until_ready(
        matrix_factorization_forward(u_idx, i_idx, params, force_gather=True))
    assert jnp.allclose(out2, ref, atol=1e-5, rtol=1e-5), (out2, ref)

    # Case 3: larger, non-multiple batch -> multi-chunk double-buffered gather.
    batch3 = 300
    u3 = jax.random.randint(ku2, (batch3,), 0, num_users, jnp.int32)
    i3 = jax.random.randint(ki2, (batch3,), 0, num_items, jnp.int32)
    ref3 = reference_forward(u3, i3, params)
    out3 = jax.block_until_ready(
        matrix_factorization_forward(u3, i3, params, force_gather=True))
    assert out3.shape == (batch3,)
    assert jnp.allclose(out3, ref3, atol=1e-5, rtol=1e-5), (out3, ref3)

    # Case 4: batch not a multiple of the tile (padding path), fast path.
    batch4 = 13
    out4 = jax.block_until_ready(
        matrix_factorization_forward(u_idx[:batch4], i_idx[:batch4], params))
    ref4 = reference_forward(u_idx[:batch4], i_idx[:batch4], params)
    assert out4.shape == (batch4,)
    assert jnp.allclose(out4, ref4, atol=1e-5, rtol=1e-5), (out4, ref4)

    print("KERNEL_OK")
</pallas_src>

<mosaic_0001>
module attributes {stable_mosaic.version = 11 : i64} {
  func.func @_mf_onehot_kernel(%arg0: i32, %arg1: memref<8x1xi32, #tpu.memory_space<vmem>>, %arg2: memref<8x1xi32, #tpu.memory_space<vmem>>, %arg3: memref<1x1x8xf32, #tpu.memory_space<vmem>>, %arg4: memref<64x128xf32, #tpu.memory_space<vmem>>, %arg5: memref<32x128xf32, #tpu.memory_space<vmem>>, %arg6: memref<1x1x8xf32, #tpu.memory_space<vmem>>) attributes {dimension_semantics = [#tpu.dimension_semantics<parallel>], iteration_bounds = array<i64: 2>, scalar_prefetch = 0 : i64, scratch_operands = 0 : i64, tpu.core_type = #tpu.core_type<tc>, window_params = [{transform_indices = @transform_0, window_bounds = array<i64: 8, 1>}, {transform_indices = @transform_1, window_bounds = array<i64: 8, 1>}, {transform_indices = @transform_2, window_bounds = array<i64: 1, 1, 8>}, {pipeline_mode = #tpu.pipeline_mode<synchronous>, transform_indices = @transform_3, window_bounds = array<i64: 64, 128>}, {pipeline_mode = #tpu.pipeline_mode<synchronous>, transform_indices = @transform_4, window_bounds = array<i64: 32, 128>}, {transform_indices = @transform_5, window_bounds = array<i64: 1, 1, 8>}]} {
    %c0 = arith.constant 0 : index
    %c0_0 = arith.constant 0 : index
    %0 = vector.load %arg1[%c0, %c0_0] : memref<8x1xi32, #tpu.memory_space<vmem>>, vector<8x1xi32>
    %c0_1 = arith.constant 0 : index
    %c0_2 = arith.constant 0 : index
    %1 = vector.load %arg2[%c0_1, %c0_2] : memref<8x1xi32, #tpu.memory_space<vmem>>, vector<8x1xi32>
    %2 = tpu.iota {dimensions = array<i32: 1>} : vector<8x64xi32>
    %3 = vector.broadcast %0 : vector<8x1xi32> to vector<8x64xi32>
    %4 = arith.cmpi eq, %2, %3 : vector<8x64xi32>
    %5 = arith.extui %4 : vector<8x64xi1> to vector<8x64xi32>
    %6 = arith.sitofp %5 : vector<8x64xi32> to vector<8x64xf32>
    %7 = tpu.iota {dimensions = array<i32: 1>} : vector<8x32xi32>
    %8 = vector.broadcast %1 : vector<8x1xi32> to vector<8x32xi32>
    %9 = arith.cmpi eq, %7, %8 : vector<8x32xi32>
    %10 = arith.extui %9 : vector<8x32xi1> to vector<8x32xi32>
    %11 = arith.sitofp %10 : vector<8x32xi32> to vector<8x32xf32>
    %c0_3 = arith.constant 0 : index
    %c0_4 = arith.constant 0 : index
    %12 = vector.load %arg4[%c0_3, %c0_4] : memref<64x128xf32, #tpu.memory_space<vmem>>, vector<64x128xf32>
    %cst = arith.constant dense<0.000000e+00> : vector<8x128xf32>
    %13 = tpu.matmul %6, %12, %cst {dimension_numbers = #tpu.dot_dimension_numbers<[1], [0], [0], [1], [0, 0, 1, 1], [], []>, precision = #tpu.contract_precision<fp32>} : vector<8x64xf32>, vector<64x128xf32>, vector<8x128xf32> -> vector<8x128xf32>
    %c0_5 = arith.constant 0 : index
    %c0_6 = arith.constant 0 : index
    %14 = vector.load %arg5[%c0_5, %c0_6] : memref<32x128xf32, #tpu.memory_space<vmem>>, vector<32x128xf32>
    %cst_7 = arith.constant dense<0.000000e+00> : vector<8x128xf32>
    %15 = tpu.matmul %11, %14, %cst_7 {dimension_numbers = #tpu.dot_dimension_numbers<[1], [0], [0], [1], [0, 0, 1, 1], [], []>, precision = #tpu.contract_precision<fp32>} : vector<8x32xf32>, vector<32x128xf32>, vector<8x128xf32> -> vector<8x128xf32>
    %16 = arith.mulf %13, %15 : vector<8x128xf32>
    %cst_8 = arith.constant 1.000000e+00 : f32
    %17 = vector.broadcast %cst_8 : f32 to vector<1x128xf32>
    %cst_9 = arith.constant dense<0.000000e+00> : vector<1x8xf32>
    %18 = tpu.matmul %17, %16, %cst_9 {dimension_numbers = #tpu.dot_dimension_numbers<[1], [1], [0], [0], [0, 0, 1, 0], [], []>, precision = #tpu.contract_precision<fp32>} : vector<1x128xf32>, vector<8x128xf32>, vector<1x8xf32> -> vector<1x8xf32>
    %c0_10 = arith.constant 0 : index
    %c0_11 = arith.constant 0 : index
    %c0_12 = arith.constant 0 : index
    %19 = vector.load %arg3[%c0_10, %c0_11, %c0_12] : memref<1x1x8xf32, #tpu.memory_space<vmem>>, vector<1x1x8xf32>
    %20 = vector.shape_cast %19 : vector<1x1x8xf32> to vector<1x8xf32>
    %21 = arith.addf %18, %20 : vector<1x8xf32>
    %c0_13 = arith.constant 0 : index
    %c0_14 = arith.constant 0 : index
    %c0_15 = arith.constant 0 : index
    %22 = vector.load %arg6[%c0_13, %c0_14, %c0_15] : memref<1x1x8xf32, #tpu.memory_space<vmem>>, vector<1x1x8xf32>
    %23 = vector.shape_cast %22 : vector<1x1x8xf32> to vector<1x8xf32>
    %24 = vector.shape_cast %21 : vector<1x8xf32> to vector<1x1x8xf32>
    tpu.vector_store %arg6[%c0_13, %c0_14, %c0_15], %24 {strides = array<i32>} : memref<1x1x8xf32, #tpu.memory_space<vmem>>, vector<1x1x8xf32>,
    return
  }
  func.func @transform_0(%arg0: i32) -> (i32, i32) {
    %c0_i32 = arith.constant 0 : i32
    %c0_i32_0 = arith.constant 0 : i32
    return %arg0, %c0_i32 : i32, i32
  }
  func.func @transform_1(%arg0: i32) -> (i32, i32) {
    %c0_i32 = arith.constant 0 : i32
    %c0_i32_0 = arith.constant 0 : i32
    return %arg0, %c0_i32 : i32, i32
  }
  func.func @transform_2(%arg0: i32) -> (i32, i32, i32) {
    %c0_i32 = arith.constant 0 : i32
    %c0_i32_0 = arith.constant 0 : i32
    %c0_i32_1 = arith.constant 0 : i32
    return %arg0, %c0_i32, %c0_i32_0 : i32, i32, i32
  }
  func.func @transform_3(%arg0: i32) -> (i32, i32) {
    %c0_i32 = arith.constant 0 : i32
    %c0_i32_0 = arith.constant 0 : i32
    %c0_i32_1 = arith.constant 0 : i32
    return %c0_i32, %c0_i32_0 : i32, i32
  }
  func.func @transform_4(%arg0: i32) -> (i32, i32) {
    %c0_i32 = arith.constant 0 : i32
    %c0_i32_0 = arith.constant 0 : i32
    %c0_i32_1 = arith.constant 0 : i32
    return %c0_i32, %c0_i32_0 : i32, i32
  }
  func.func @transform_5(%arg0: i32) -> (i32, i32, i32) {
    %c0_i32 = arith.constant 0 : i32
    %c0_i32_0 = arith.constant 0 : i32
    %c0_i32_1 = arith.constant 0 : i32
    return %arg0, %c0_i32, %c0_i32_0 : i32, i32, i32
  }
}

</mosaic_0001>

<bundles_post_ra>
// kernel: tpu_custom_call.1
= control target key start
LH: loop header
LB: loop body
LE: loop exit
PB: predicated region body
PF: predicated region fallthrough
CT: control target
= control target key end

     0   :  { %10 = vsyncpa [#allocation3], 0  ;;  %s2910_s0 = inlined_call_operand.vmem [shape: s32[16,1], index: 0, kind: input, shape index: {}]   ;;  %s2911_s1 = inlined_call_operand.vmem [shape: s32[16,1], index: 1, kind: input, shape index: {}]   ;;  %s2912_s2 = inlined_call_operand.vmem [shape: f32[2,1,8], index: 2, kind: input, shape index: {}]   ;;  %s2913_s3 = inlined_call_operand.hbm [shape: f32[64,128], index: 3, kind: input, shape index: {}]   ;;  %s2914_s4 = inlined_call_operand.vmem [shape: f32[32,128], index: 4, kind: input, shape index: {}]   ;;  %s2915_s5 = inlined_call_operand.hbm [shape: f32[2,1,8], index: 5, kind: output, shape index: {}]  }
   0x1   :  { %11 = vsyncpa [#allocation4], 0 }
   0x2   :  { %13 = vsyncpa [#allocation4 + $0x1], 0  ;;  %s2516_s18 = smov 0   ;;  %s2518_s19 = smov 0  }
   0x3   :  { %s2520_s20 = smov 0   ;;  %s2522_s21 = smov 0  }
   0x4 LB: > { %s2537_s22 = sadd.s32 4294967295, %s2475_s21   ;;  %s1861_s23 = sadd.s32 4294967294, %s2475_s21   ;;  %s2475_s21 = sphi %s2522_s21, %s2931_s21   ;;  %s2471_s20 = sphi %s2520_s20, %s2930_s20   ;;  %s2467_s19 = sphi %s2518_s19, %s2929_s19   ;;  %s2463_s18 = sphi %s2516_s18, %s2928_s18  }
   0x5   : > { %s2541_s24 = sadd.s32 1, %s2475_s21   ;;  %s146_s25 = sadd.s32 1, %s2471_s20 }
   0x6   : > { %s143_s26 = ssub.s32 %s2475_s21, %s2541_s24  ;;  %p156_p0 = scmp.ne.s32.totalorder %s2471_s20, %s2467_s19 }
   0x7   : > { %p144_p1 = scmp.eq.s32.totalorder %s143_s26, 0  ;;  %p157_p2 = scmp.eq.s32.totalorder %s2537_s22, 1 }
   0x8   : > { %p162_p3 = scmp.ne.s32.totalorder %s2467_s19, %s2463_s18  ;;  %p163_p4 = scmp.eq.s32.totalorder %s1861_s23, 1 }
   0x9   : > { %s2552_s27 = scalar_select %p144_p1, %s2471_s20, %s146_s25  }
   0xa   : > { %p2554_p5 = por %p157_p2, %p156_p0  ;;  %p2558_p6 = por %p163_p4, %p162_p3 }
   0xb   : > { %p1862_p7 = scmp.ge.s32.totalorder %s2475_s21, 1  ;;  %p170_p8 = scmp.lt.s32.totalorder %s2475_s21, 3 }
   0xc   : > { %s2919_s28 = scalar_select %p2554_p5, 1, 0 }
   0xd   : > { %s2920_s29 = scalar_select %p2558_p6, 1, 0 }
   0xe   : > { %p2916_p9 = scmp.eq.s32.totalorder %s2537_s22, 0  ;;  %p2565_p10 = pnand %p1862_p7, %p170_p8 }
   0xf   : > { %s2477_s6 = smov [#allocation2]   ;;  %s2381_s11 = scalar_lea.hbm %s2913_s3, 1024 }
  0x10   : > { %s2921_s30 = scalar_select %p2565_p10, 1, 0 }
  0x11   : > { %s182_s7 = sshll.u32 %s2477_s6, 4  ;;  %p2329_p11 = pneg %p2565_p10  ;;  %s183_s7 = int_to_ptr.vmem [resolvable:$true] %s182_s7 }
  0x12   : > { %p2382_p13 = scmp.ne.s32.totalorder %s2913_s3, %s2381_s11  ;;  %p2388_p3 = scmp.lt.u32.totalorder %s2381_s11, %s2913_s3 }
  0x13   : > { %p2573_p12 = pnand %p2916_p9, %p2329_p11 }
  0x15   : > { %p2383_p0 = pneg %p2573_p12 }
  0x17   : > { %p2384_p1 = pnand %p2383_p0, %p2382_p13 }
  0x19   : > { %p2385_p2 = pneg %p2384_p1 }
  0x1b   : > { %p2390_p4 = pnand %p2388_p3, %p2385_p2 }
  0x1d   : > { %2393 = shalt.err (!%p2390_p4)
}
  0x1e   : > { %s2394_s16 = scalar_lea.vmem %s183_s7, 1024  ;;  %p2402_p9 = scmp.lt.s32.totalorder %s183_s7, %s183_s7 }
  0x1f   : > { %p2395_p7 = scmp.ne.s32.totalorder %s183_s7, %s2394_s16  ;;  %p2403_p6 = scmp.lt.s32.totalorder %s2394_s16, %s2394_s16 }
  0x21   : > { %p2397_p8 = pnand %p2395_p7, %p2383_p0  ;;  %p2404_p5 = por %p2403_p6, %p2402_p9 }
  0x23   : > { %p2398_p11 = pneg %p2397_p8 }
  0x25   : > { %p2405_p10 = pnand %p2404_p5, %p2398_p11 }
  0x27   : > { %2408 = shalt.err (!%p2405_p10)
}
  0x28   : > { %s2478_s17 = smov 128   ;;  %s2479_s23 = smov 8  }
  0x29   : > { %2332 = dma.hbm_to_vmem [thread:$0]  (!%p2573_p12), %s2913_s3, 1024, %s183_s7, [#allocation3], %s2478_s17, %s2478_s17, %s2479_s23  }
  0x2a   : > { %p2923_p13 = scmp.ne.s32.totalorder %s2921_s30, 0 }
  0x2b   : > { %p2924_p1 = scmp.eq.s32.totalorder (!%p2923_p13), %s2537_s22, 0 }
  0x2c   : > { %221 = sbr.rel (%p2923_p13) target bundleno = 742 (0x2e6), region = 40 }
  0x33   : > { %2454 = dma.done.wait (%p2924_p1), [#allocation3], 1024   ;;  %p2925_p0 = pmov %p2924_p1 }
  0x34   : > { %p254_p5 = scmp.lt.s32.totalorder %s2537_s22, 1  ;;  %v2480_v0 = vmov 0   ;;  %v2481_v1 = vmov 0.0|0.0   ;;  %v281_v4 = vld [vmem:[#allocation2] sm:$0xff]  ;;  %v282_v5 = vld [vmem:[#allocation2 + $0x8] sm:$0xff]  ;;  %v283_v7 = vld [vmem:[#allocation2 + $0x10] sm:$0xff] }
  0x35   : > { %2456 = vsyncadd (%p2925_p0), [#allocation3], 4294966272  ;;  %2380 = vset.pattern.permute.xlu0 %v2480_v0  ;;  %2198 = vmatprep.subr.bf16.mxu0 %v2481_v1  ;;  %v294_v6 = vand.u32 4294901760, %v281_v4  ;;  %v284_v8 = vld [vmem:[#allocation2 + $0x18] sm:$0xff]  ;;  %v297_v9 = vand.u32 4294901760, %v282_v5  ;;  %v300_v10 = vand.u32 4294901760, %v283_v7 }
  0x36   : > { %s2602_s6 = scalar_select %p254_p5, %s2537_s22, 1  ;;  %2186 = vmatprep.subr.bf16.mxu1 %v2481_v1  ;;  %v303_v11 = vand.u32 4294901760, %v284_v8  ;;  %v285_v12 = vld [vmem:[#allocation2 + $0x20] sm:$0xff]  ;;  %v286_v13 = vld [vmem:[#allocation2 + $0x28] sm:$0xff]  ;;  %v287_v14 = vld [vmem:[#allocation2 + $0x30] sm:$0xff]  ;;  %vm2482_vm0 = vmmov 0  }
  0x37   : > { %v2483_v15 = vmov 0.0   ;;  %v2616_v16 = vsub.f32 %v281_v4, %v294_v6  ;;  %v306_v17 = vand.u32 4294901760, %v285_v12  ;;  %v309_v18 = vand.u32 4294901760, %v286_v13  ;;  %v288_v19 = vld [vmem:[#allocation2 + $0x38] sm:$0xff]  ;;  %s1877_s10 = sshll.u32 %s2537_s22, 4  ;;  %p2926_p9 = scmp.ne.s32.totalorder %s2919_s28, 0 }
  0x38   : > { %s1867_s30 = sshll.u32 %s2602_s6, 3  ;;  %2011 = vmatprep.mubr.msk.f32.mxu0 %vm2482_vm0, %v2483_v15  ;;  %1992 = vmatprep.mubr.msk.f32.mxu1 %vm2482_vm0, %v2483_v15  ;;  %v312_v20 = vand.u32 4294901760, %v287_v14  ;;  %v2618_v21 = vsub.f32 %v282_v5, %v297_v9  ;;  %v2620_v22 = vsub.f32 %v283_v7, %v300_v10  ;;  %v2622_v23 = vsub.f32 %v284_v8, %v303_v11  ;;  %v830_v7 = vld [vmem:[%s2914_s4] sm:$0xff]  ;;  %v831_v8 = vld [vmem:[%s2914_s4 + $0x8] sm:$0xff]  ;;  %s264_s8 = scalar_lea.vmem %s2912_s2, %s2602_s6 }
  0x39   : > { %s257_s9 = scalar_lea.vmem %s2910_s0, %s1867_s30  ;;  %s261_s12 = scalar_lea.vmem %s2911_s1, %s1867_s30  ;;  %v2624_v24 = vpack.c.bf16 %v297_v9, %v294_v6  ;;  %v379_v25 = vand.u32 4294901760, %v2616_v16  ;;  %v2627_v26 = vsub.f32 %v285_v12, %v306_v17  ;;  %v2629_v27 = vsub.f32 %v286_v13, %v309_v18  ;;  %v832_v12 = vld [vmem:[%s2914_s4 + $0x10] sm:$0xff]  ;;  %v833_v13 = vld [vmem:[%s2914_s4 + $0x18] sm:$0xff] }
  0x3a   : > { %v265_v2 = vld [vmem:[%s257_s9] sm:$0xff]  ;;  %v315_v28 = vand.u32 4294901760, %v288_v19  ;;  %v386_v29 = vand.u32 4294901760, %v2618_v21  ;;  %v393_v30 = vand.u32 4294901760, %v2620_v22  ;;  %v400_v31 = vand.u32 4294901760, %v2622_v23  ;;  %s252_s9 = sand.u32 1, %s2467_s19   ;;  %s2868_s15 = scalar_lea.hbm %s2915_s5, %s1877_s10 }
  0x3b   : > { %v266_v3 = vld [vmem:[%s261_s12] sm:$0xff]  ;;  %270 = vperm.xlu0 %2380, %v265_v2   ;;  %2188 = vmatpush3.bf16.msra.mxu1 %v2624_v24  ;;  %v2635_v32 = vsub.f32 %v287_v14, %v312_v20  ;;  %v380_v33 = vsub.f32 %v2616_v16, %v379_v25  ;;  %v407_v34 = vand.u32 4294901760, %v2627_v26  ;;  %v414_v35 = vand.u32 4294901760, %v2629_v27  ;;  %s253_s11 = scalar_lea.vmem [#allocation5], %s252_s9  ;;  %s1761_s6 = scalar_lea.sflag [#allocation4], %s252_s9 }
  0x3c   : > { %2189 = vmatprep.subr.bf16.mxu1 %v2481_v1  ;;  %v2641_v36 = vsub.f32 %v288_v19, %v315_v28  ;;  %v387_v37 = vsub.f32 %v2618_v21, %v386_v29  ;;  %v394_v38 = vsub.f32 %v2620_v22, %v393_v30  ;;  %v401_v39 = vsub.f32 %v2622_v23, %v400_v31  ;;  %s1773_s12 = sshll.u32 %s253_s11, 4  ;;  %s2485_s22 = smov [#allocation5]   ;;  %s2870_s12 = int_to_ptr.vmem [resolvable:$true] %s1773_s12 }
  0x3d   : > { %v421_v40 = vand.u32 4294901760, %v2635_v32  ;;  %v381_v41 = vand.u32 4294901760, %v380_v33  ;;  %v408_v42 = vsub.f32 %v2627_v26, %v407_v34  ;;  %v415_v47 = vsub.f32 %v2629_v27, %v414_v35  ;;  %s2409_s16 = scalar_lea.vmem %s2870_s12, 16  ;;  %s2413_s17 = sshll.u32 %s2485_s22, 4  ;;  %s2414_s17 = int_to_ptr.vmem [resolvable:$false] %s2413_s17 }
  0x3e   : > { %v428_v43 = vand.u32 4294901760, %v2641_v36  ;;  %v388_v44 = vand.u32 4294901760, %v387_v37  ;;  %v395_v45 = vand.u32 4294901760, %v394_v38  ;;  %v402_v46 = vand.u32 4294901760, %v401_v39  ;;  %p2410_p6 = scmp.ne.s32.totalorder %s2870_s12, %s2409_s16  ;;  %s2415_s23 = scalar_lea.vmem %s2414_s17, 32 }
  0x3f   : > { %276 = vperm.xlu0 %2380, %v266_v3   ;;  %v2650_v48 = vpack.c.bf16 %v303_v11, %v300_v10  ;;  %v422_v50 = vsub.f32 %v2635_v32, %v421_v40  ;;  %v409_v51 = vand.u32 4294901760, %v408_v42  ;;  %v2211_v53 = vpack.c.bf16 %v2618_v21, %v2616_v16  ;;  %p2416_p2 = scmp.lt.s32.totalorder %s2870_s12, %s2414_s17  ;;  %p2417_p3 = scmp.lt.s32.totalorder %s2415_s23, %s2409_s16 }
  0x40   : > { %v2199_v49 = vpack.c.bf16 %v388_v44, %v381_v41  ;;  %v429_v52 = vsub.f32 %v2641_v36, %v428_v43  ;;  %v2657_v54 = vpack.c.bf16 %v309_v18, %v306_v17  ;;  %v2202_v55 = vpack.c.bf16 %v402_v46, %v395_v45  ;;  %p2411_p10 = pnand %p2410_p6, %p2926_p9 }
  0x41   : > { %2191 = vmatpush3.bf16.msra.mxu1 %v2650_v48  ;;  %v416_v56 = vand.u32 4294901760, %v415_v47  ;;  %v2214_v57 = vpack.c.bf16 %v2622_v23, %v2620_v22  ;;  %v2217_v58 = vpack.c.bf16 %v2629_v27, %v2627_v26  ;;  %v2220_v59 = vpack.c.bf16 %v2641_v36, %v2635_v32  ;;  %p2418_p4 = por %p2417_p3, %p2416_p2 }
  0x42   : > { %2200 = vmatpush3.bf16.msra.mxu0 %v2199_v49  ;;  %2192 = vmatprep.subr.bf16.mxu1 %v2481_v1  ;;  %v2668_v60 = vpack.c.bf16 %v315_v28, %v312_v20  ;;  %v423_v62 = vand.u32 4294901760, %v422_v50  ;;  %v430_v63 = vand.u32 4294901760, %v429_v52  ;;  %v2676_v2 = vpack.c.bf16 %v386_v29, %v379_v25  ;;  %p2412_p12 = pneg %p2411_p10 }
  0x43   : > { %2201 = vmatprep.subr.bf16.mxu0 %v2481_v1  ;;  %v2205_v61 = vpack.c.bf16 %v416_v56, %v409_v51  ;;  %v2678_v3 = vpack.c.bf16 %v400_v31, %v393_v30  ;;  %v2680_v4 = vpack.c.bf16 %v414_v35, %v407_v34  ;;  %v2682_v5 = vpack.c.bf16 %v428_v43, %v421_v40 }
  0x44   : > { %v2208_v0 = vpack.c.bf16 %v430_v63, %v423_v62  ;;  %v267_v6 = vlaneseq  ;;  %v839_v10 = vand.u32 4294901760, %v830_v7  ;;  %v842_v11 = vand.u32 4294901760, %v831_v8  ;;  %p2419_p7 = pnand %p2418_p4, %p2412_p12 }
  0x45   : > { %2194 = vmatpush3.bf16.msra.mxu1 %v2657_v54  ;;  %vm289_vm1 = vcmask 523264   ;;  %v845_v16 = vand.u32 4294901760, %v832_v12  ;;  %v848_v19 = vand.u32 4294901760, %v833_v13  ;;  %vm834_vm3 = vcmask 261120  }
  0x46   : > { %2203 = vmatpush3.bf16.msra.mxu0 %v2202_v55  ;;  %2195 = vmatprep.subr.bf16.mxu1 %v2481_v1  ;;  %v268_v9 = vand.u32 127, %v267_v6  ;;  %v2696_v17 = vsub.f32 %v830_v7, %v839_v10  ;;  %v2698_v18 = vsub.f32 %v831_v8, %v842_v11  ;;  %v2727_v38 = vpack.c.bf16 %v842_v11, %v839_v10  ;;  %v1324_v7 = vld [vmem:[%s264_s8] sm:$0x1] }
  0x47   : > { %2204 = vmatprep.subr.bf16.mxu0 %v2481_v1  ;;  %v2709_v25 = vsub.f32 %v832_v12, %v845_v16  ;;  %v2714_v28 = vsub.f32 %v833_v13, %v848_v19  ;;  %v2742_v45 = vpack.c.bf16 %v848_v19, %v845_v16  ;;  %vm1758_vm5 = vcmask 57344  }
  0x48   : > { %v920_v29 = vand.u32 4294901760, %v2696_v17  ;;  %v927_v30 = vand.u32 4294901760, %v2698_v18  ;;  %v2271_v36 = vpack.c.bf16 %v2698_v18, %v2696_v17 }
  0x49   : > { %2197 = vmatpush3.bf16.msra.mxu1 %v2668_v60  ;;  %v934_v41 = vand.u32 4294901760, %v2709_v25  ;;  %v941_v42 = vand.u32 4294901760, %v2714_v28  ;;  %v2274_v55 = vpack.c.bf16 %v2714_v28, %v2709_v25 }
  0x4a   : > { %2206 = vmatpush3.bf16.msra.mxu0 %v2205_v61  ;;  %2258 = vmatprep.subr.bf16.mxu1 %v2481_v1  ;;  %v921_v39 = vsub.f32 %v2696_v17, %v920_v29  ;;  %v928_v40 = vsub.f32 %v2698_v18, %v927_v30  ;;  %v2283_v56 = vpack.c.bf16 %v927_v30, %v920_v29 }
  0x4b   : > { %2207 = vmatprep.subr.bf16.mxu0 %v2481_v1  ;;  %v935_v49 = vsub.f32 %v2709_v25, %v934_v41  ;;  %v942_v50 = vsub.f32 %v2714_v28, %v941_v42 }
  0x4c   : > { %v922_v46 = vand.u32 4294901760, %v921_v39  ;;  %v929_v47 = vand.u32 4294901760, %v928_v40 }
  0x4d   : > { %v936_v51 = vand.u32 4294901760, %v935_v49  ;;  %v943_v52 = vand.u32 4294901760, %v942_v50 }
  0x4e   : > { %2209 = vmatpush3.bf16.msra.mxu0 %v2208_v0  ;;  %v2265_v27 = vpack.c.bf16 %v929_v47, %v922_v46 }
  0x4f   : > { %2210 = vmatprep.subr.bf16.mxu0 %v2481_v1  ;;  %v2268_v32 = vpack.c.bf16 %v943_v52, %v936_v51 }
  0xba   : > { %v271_v14 = vpop.permute.xlu0 %270 }
  0xbb   : > { %vm272_vm2 = vcmp.eq.s32.totalorder %v268_v9, %v271_v14 }
  0xbc   : > { %v2701_v20 = vsel %vm272_vm2, 1.0, %v2483_v15 }
  0xbd   : > { %v291_v21 = vsel %vm289_vm1, %v2701_v20, 0  ;;  %2012 = vmatmul.mubr.msk.f32.vlgmr.msra.gmra.mrb[0].mxu0 %vm289_vm1, %v2701_v20 }
  0xbe   : > { %v2707_v22 = vsub.f32 %v291_v21, %v291_v21  ;;  %2212 = vmatpush3.bf16.msra.mxu0 %v2211_v53  ;;  %v277_v23 = vpop.permute.xlu0 %276  ;;  %2030 = vmatprep.mubr.msk.f32.mxu0 %vm2482_vm0, %v2483_v15 }
  0xbf   : > { %vm278_vm4 = vcmp.eq.s32.totalorder %v268_v9, %v277_v23  ;;  %2213 = vmatprep.subr.bf16.mxu0 %v2481_v1 }
  0xc0   : > { %v2719_v31 = vsel %vm278_vm4, 1.0, %v2483_v15  ;;  %v368_v33 = vand.u32 4294901760, %v2707_v22 }
  0xc1   : > { %v836_v34 = vsel %vm834_vm3, %v2719_v31, 0 }
  0xc2   : > { %v2724_v35 = vsub.f32 %v836_v34, %v836_v34  ;;  %2215 = vmatpush3.bf16.msra.mxu0 %v2214_v57  ;;  %v369_v37 = vsub.f32 %v2707_v22, %v368_v33  ;;  %v2286_v57 = vpack.c.bf16 %v941_v42, %v934_v41 }
  0xc3   : > { %2216 = vmatprep.subr.bf16.mxu0 %v2481_v1 }
  0xc4   : > { %v370_v43 = vand.u32 4294901760, %v369_v37  ;;  %v909_v44 = vand.u32 4294901760, %v2724_v35 }
  0xc6   : > { %2218 = vmatpush3.bf16.msra.mxu0 %v2217_v58  ;;  %1993 = vmatmul.mubr.f32.vlgmr.msra.gmra.mrb[0].mxu1 %v370_v43  ;;  %v910_v26 = vsub.f32 %v2724_v35, %v909_v44 }
  0xc7   : > { %2260 = vmatpush3.bf16.msra.mxu1 %v2727_v38  ;;  %2219 = vmatprep.subr.bf16.mxu0 %v2481_v1 }
  0xc8   : > { %2261 = vmatprep.subr.bf16.mxu1 %v2481_v1  ;;  %2098 = vmatprep.mubr.msk.f32.mxu1 %vm2482_vm0, %v2483_v15  ;;  %v911_v53 = vand.u32 4294901760, %v910_v26 }
  0xca   : > { %2221 = vmatpush3.bf16.msra.mxu0 %v2220_v59 }
  0xcb   : > { %2263 = vmatpush3.bf16.msra.mxu1 %v2742_v45  ;;  %2222 = vmatprep.subr.bf16.mxu0 %v2481_v1 }
  0xcc   : > { %2264 = vmatprep.subr.bf16.mxu1 %v2481_v1 }
  0xcd   : > { %2031 = vmatmul.mubr.f32.vlgmr.msra.gmra.mrb[0].mxu0 %v2707_v22 }
  0xce   : > { %2224 = vmatpush3.bf16.msra.mxu0 %v2624_v24  ;;  %2099 = vmatmul.mubr.f32.vlgmr.msra.gmra.mrb[2].mxu1 %v911_v53 }
  0xcf   : > { %2266 = vmatpush3.bf16.msra.mxu1 %v2265_v27  ;;  %2225 = vmatprep.subr.bf16.mxu0 %v2481_v1 }
  0xd0   : > { %2267 = vmatprep.subr.bf16.mxu1 %v2481_v1  ;;  %2109 = vmatprep.mubr.msk.f32.mxu1 %vm2482_vm0, %v2483_v15 }
  0xd1   : > { %2049 = vmatprep.mubr.msk.f32.mxu0 %vm2482_vm0, %v2483_v15 }
  0xd2   : > { %2227 = vmatpush3.bf16.msra.mxu0 %v2650_v48 }
  0xd3   : > { %2269 = vmatpush3.bf16.msra.mxu1 %v2268_v32  ;;  %2228 = vmatprep.subr.bf16.mxu0 %v2481_v1 }
  0xd4   : > { %2270 = vmatprep.subr.bf16.mxu1 %v2481_v1 }
  0xd6   : > { %2230 = vmatpush3.bf16.msra.mxu0 %v2657_v54  ;;  %2110 = vmatmul.mubr.msk.f32.vlgmr.msra.gmra.mrb[2].mxu1 %vm834_vm3, %v2719_v31 }
  0xd7   : > { %2272 = vmatpush3.bf16.msra.mxu1 %v2271_v36  ;;  %2231 = vmatprep.subr.bf16.mxu0 %v2481_v1 }
  0xd8   : > { %2273 = vmatprep.subr.bf16.mxu1 %v2481_v1  ;;  %2120 = vmatprep.mubr.msk.f32.mxu1 %vm2482_vm0, %v2483_v15 }
  0xda   : > { %2233 = vmatpush3.bf16.msra.mxu0 %v2668_v60 }
  0xdb   : > { %2275 = vmatpush3.bf16.msra.mxu1 %v2274_v55  ;;  %2234 = vmatprep.subr.bf16.mxu0 %v2481_v1 }
  0xdc   : > { %2276 = vmatprep.subr.bf16.mxu1 %v2481_v1 }
  0xdd   : > { %2050 = vmatmul.mubr.f32.vlgmr.msra.gmra.mrb[0].mxu0 %v368_v33 }
  0xde   : > { %2236 = vmatpush3.bf16.msra.mxu0 %v2676_v2  ;;  %2121 = vmatmul.mubr.f32.vlgmr.msra.gmra.mrb[2].mxu1 %v2724_v35 }
  0xdf   : > { %2278 = vmatpush3.bf16.msra.mxu1 %v2727_v38  ;;  %2237 = vmatprep.subr.bf16.mxu0 %v2481_v1 }
  0xe0   : > { %2279 = vmatprep.subr.bf16.mxu1 %v2481_v1  ;;  %2131 = vmatprep.mubr.msk.f32.mxu1 %vm2482_vm0, %v2483_v15 }
  0xe1   : > { %2068 = vmatprep.mubr.msk.f32.mxu0 %vm2482_vm0, %v2483_v15 }
  0xe2   : > { %2239 = vmatpush3.bf16.msra.mxu0 %v2678_v3 }
  0xe3   : > { %2281 = vmatpush3.bf16.msra.mxu1 %v2742_v45  ;;  %2240 = vmatprep.subr.bf16.mxu0 %v2481_v1 }
  0xe4   : > { %2282 = vmatprep.subr.bf16.mxu1 %v2481_v1 }
  0xe6   : > { %2242 = vmatpush3.bf16.msra.mxu0 %v2680_v4  ;;  %2132 = vmatmul.mubr.f32.vlgmr.msra.gmra.mrb[2].mxu1 %v909_v44  ;;  %v2484_v4 = vmov 1.0  }
  0xe7   : > { %2284 = vmatpush3.bf16.msra.mxu1 %v2283_v56  ;;  %2243 = vmatprep.subr.bf16.mxu0 %v2481_v1 }
  0xe8   : > { %2285 = vmatprep.subr.bf16.mxu1 %v2481_v1  ;;  %2142 = vmatprep.mubr.msk.f32.mxu1 %vm2482_vm0, %v2483_v15 }
  0xea   : > { %2245 = vmatpush3.bf16.msra.mxu0 %v2682_v5 }
  0xeb   : > { %2287 = vmatpush3.bf16.msra.mxu1 %v2286_v57  ;;  %2246 = vmatprep.subr.bf16.mxu0 %v2481_v1 }
  0xec   : > { %2288 = vmatprep.subr.bf16.mxu1 %v2481_v1 }
  0xed   : > { %2069 = vmatmul.mubr.msk.f32.vlgmr.msra.gmra.mrb[0].mxu0 %vm289_vm1, %v2701_v20 }
  0xee   : > { %2248 = vmatpush3.bf16.msra.mxu0 %v2624_v24  ;;  %2143 = vmatmul.mubr.msk.f32.vlgmr.msra.gmra.mrb[2].mxu1 %vm834_vm3, %v2719_v31 }
  0xef   : > { %2290 = vmatpush3.bf16.msra.mxu1 %v2727_v38  ;;  %2249 = vmatprep.subr.bf16.mxu0 %v2481_v1 }
  0xf0   : > { %2291 = vmatprep.subr.bf16.mxu1 %v2481_v1  ;;  %2153 = vmatprep.mubr.msk.f32.mxu1 %vm2482_vm0, %v2483_v15 }
  0xf1   : > { %2087 = vmatprep.mubr.msk.f32.mxu0 %vm2482_vm0, %v2483_v15 }
  0xf2   : > { %2251 = vmatpush3.bf16.msra.mxu0 %v2650_v48 }
  0xf3   : > { %2293 = vmatpush3.bf16.msra.mxu1 %v2742_v45  ;;  %2252 = vmatprep.subr.bf16.mxu0 %v2481_v1 }
  0xf4   : > { %2161 = vmatprep.subr.mxu1 %v2483_v15 }
  0xf6   : > { %2254 = vmatpush3.bf16.msra.mxu0 %v2657_v54  ;;  %2154 = vmatmul.mubr.msk.f32.vlgmr.msra.gmra.mrb[2].mxu1 %vm834_vm3, %v2719_v31 }
  0xf7   : > { %2255 = vmatprep.subr.bf16.mxu0 %v2481_v1  ;;  %2163 = vmatprep.mubr.msk.f32.mxu1 %vm2482_vm0, %v2483_v15 }
  0xfa   : > { %2257 = vmatpush3.bf16.msra.mxu0 %v2668_v60 }
  0xfb   : > { %2156 = vmatprep.subr.mxu0 %v2483_v15 }
  0xfd   : > { %2088 = vmatmul.mubr.msk.f32.vlgmr.msra.gmra.mrb[0].mxu0 %vm289_vm1, %v2701_v20 }
  0xfe   : > { %2158 = vmatprep.mubr.msk.f32.mxu0 %vm2482_vm0, %v2483_v15 }
 0x199   : > { %v372_v24 = vpop.f32.mrb[0].mxu1 }
 0x19a   : > { %v1994_v48 = vpop.f32.mrb[1].mxu1 }
 0x1c9   : > { %v1319_v54 = vpop.f32.mrb[2].mxu1 }
 0x1ca   : > { %v2155_v58 = vpop.f32.mrb[3].mxu1 }
 0x1d0   : > { %v826_v59 = vpop.f32.mrb[0].mxu0 }
 0x1d1   : > { %v2294_v61 = vadd.f32 %v826_v59, %v372_v24  ;;  %v2089_v1 = vpop.f32.mrb[1].mxu0 }
 0x1d3   : > { %v1323_v62 = vmul.f32 %v2294_v61, %v1319_v54 }
 0x1d5   : > { %v1326_v63 = vand.u32 4294901760, %v1323_v62 }
 0x1d7   : > { %v1398_v0 = vsub.f32 %v1323_v62, %v1326_v63  ;;  %2157 = vmatpush3.xpose.msra.mxu0 %v1326_v63 }
 0x1d9   : > { %v1399_v60 = vand.u32 4294901760, %v1398_v0 }
 0x1da   : > { %2159 = vmatmul.mubr.f32.vlgmr.msra.gmra.mrb[2].mxu0 %v2483_v15 }
 0x1db   : > { %v1400_v2 = vsub.f32 %v1398_v0, %v1399_v60 }
 0x1dd   : > { %v1401_v3 = vand.u32 4294901760, %v1400_v2 }
 0x1df   : > { %2162 = vmatpush3.xpose.msra.mxu1 %v1401_v3 }
 0x1e0   : > { %2166 = vmatprep.subr.mxu1 %v2483_v15 }
 0x1e2   : > { %2164 = vmatmul.mubr.f32.vlgmr.msra.gmra.mrb[4].mxu1 %v2484_v4 }
 0x1e3   : > { %2167 = vmatpush3.xpose.msra.mxu1 %v1398_v0  ;;  %2168 = vmatprep.mubr.msk.f32.mxu1 %vm2482_vm0, %v2483_v15 }
 0x1e4   : > { %2171 = vmatprep.subr.mxu1 %v2483_v15 }
 0x1ea   : > { %2169 = vmatmul.mubr.f32.vlgmr.msra.gmra.mrb[4].mxu1 %v2483_v15 }
 0x1eb   : > { %2172 = vmatpush3.xpose.msra.mxu1 %v1326_v63  ;;  %2173 = vmatprep.mubr.msk.f32.mxu1 %vm2482_vm0, %v2483_v15 }
 0x1ec   : > { %2176 = vmatprep.subr.mxu1 %v2483_v15 }
 0x1f2   : > { %2174 = vmatmul.mubr.f32.vlgmr.msra.gmra.mrb[4].mxu1 %v2483_v15 }
 0x1f3   : > { %2177 = vmatpush3.xpose.msra.mxu1 %v1399_v60  ;;  %2178 = vmatprep.mubr.msk.f32.mxu1 %vm2482_vm0, %v2483_v15 }
 0x1f4   : > { %2181 = vmatprep.subr.mxu1 %v2483_v15 }
 0x1fa   : > { %2179 = vmatmul.mubr.f32.vlgmr.msra.gmra.mrb[4].mxu1 %v2484_v4 }
 0x1fb   : > { %2182 = vmatpush3.xpose.msra.mxu1 %v1326_v63  ;;  %2183 = vmatprep.mubr.msk.f32.mxu1 %vm2482_vm0, %v2483_v15 }
 0x202   : > { %2184 = vmatmul.mubr.f32.vlgmr.msra.gmra.mrb[4].mxu1 %v2484_v4 }
 0x2ad   : > { %v1392_v5 = vpop.f32.mrb[2].mxu0 }
 0x2ae   : > { %v2160_v6 = vpop.f32.mrb[3].mxu0  ;;  %v1393_v8 = vadd.f32 %v1392_v5, %v1324_v7 }
 0x2d5   : > { %v1754_v9 = vpop.f32.mrb[4].mxu1 }
 0x2d6   : > { %v2296_v10 = vadd.f32 %v1754_v9, %v1393_v8  ;;  %v2185_v11 = vpop.f32.mrb[5].mxu1 }
 0x2d8   : > { %1759 = vst.msk [vmem:[%s253_s11] sm:$0x1] %vm1758_vm5, %v2296_v10 }
 0x2d9   : > { %2422 = shalt.err (!%p2419_p7)
}
 0x2da   : > { %s2423_s25 = scalar_lea.hbm %s2868_s15, 16  ;;  %s2427_s7 = scalar_lea.hbm %s2915_s5, 32 }
 0x2db   : > { %p2424_p8 = scmp.ne.s32.totalorder %s2868_s15, %s2423_s25  ;;  %p2428_p1 = scmp.lt.u32.totalorder %s2868_s15, %s2915_s5 }
 0x2dc   : > { %p2429_p0 = scmp.lt.u32.totalorder %s2427_s7, %s2423_s25  ;;  %p2431_p6 = scmp.lt.u32.totalorder %s2423_s25, %s2868_s15 }
 0x2dd   : > { %p2425_p11 = pnand %p2424_p8, %p2926_p9 }
 0x2de   : > { %p2430_p5 = por %p2429_p0, %p2428_p1 }
 0x2df   : > { %p2426_p13 = pneg %p2425_p11 }
 0x2e0   : > { %p2432_p10 = por %p2431_p6, %p2430_p5 }
 0x2e2   : > { %p2433_p12 = pnand %p2432_p10, %p2426_p13 }
 0x2e4   : > { %2436 = shalt.err (!%p2433_p12)
}
 0x2e5   : > { %2327 = dma.vmem_to_hbm [thread:$0]  (%p2926_p9), %s2870_s12, 16, %s2868_s15, %s1761_s6  }
 0x2e6 PF: > { %p2339_p2 = scmp.ge.s32.totalorder %s2475_s21, 2  ;;  %s1785_s10 = sand.u32 1, %s2463_s18  }
 0x2e7   : > { %p2927_p3 = scmp.ne.s32.totalorder %s2920_s29, 0  ;;  %s1786_s11 = scalar_lea.sflag [#allocation4], %s1785_s10 }
 0x2e9   : > { %p2334_p4 = pnand %p2339_p2, %p2927_p3 }
 0x2eb   : > { %2458 = dma.done.wait (!%p2334_p4), %s1786_s11, 16  }
 0x2ec   : > { %2460 = vsyncadd (!%p2334_p4), %s1786_s11, 4294967280  ;;  %p16_p7 = scmp.ge.s32.totalorder %s2541_s24, 4   ;;  %s2928_s18 = smov %s2467_s19 }
 0x2ed   : > { %s2929_s19 = smov %s2471_s20  ;;  %s2930_s20 = smov %s2552_s27 }
 0x2ee   : > { %s2931_s21 = smov %s2541_s24  ;;  %18 = sbr.rel (!%p16_p7) target bundleno = 4 (0x4), region = 86 }
 0x2f5   :  { %1790 = vsyncpa [#allocation3], 1 }
 0x2f6   :  { %1792 = vsyncpa [#allocation3 + $0x1], 1 }
 0x2f7   :  { %1793 = vsyncpa [#allocation4], 1 }
 0x2f8   :  { %1795 = vsyncpa [#allocation4 + $0x1], 1 }

</bundles_post_ra>
